<compile_context>
chip_gen: v7x
topology: tpu7x:2x2x1
jax: 0.10.0
libtpu: 0.0.40
codegen_flags: <defaults>
</compile_context>

<pallas_src>
import jax
import jax.numpy as jnp
from jax.experimental import pallas as pl
from jax.experimental.pallas import tpu as pltpu


def make_mlp_q_kernel(num_hidden, activation):
    """Kernel factory: fused MLP in transposed (features, batch-tile) orientation."""

    def kernel(*refs):
        # refs = xt, (W_i, b_i) * num_hidden, W_out, b_out, o_ref
        xt_ref = refs[0]
        o_ref = refs[-1]
        h = xt_ref[...]                                   # (in_dim, tm)
        idx = 1
        for _ in range(num_hidden):
            w_ref = refs[idx]
            b_ref = refs[idx + 1]
            idx += 2
            # (h_out, h_in) @ (h_in, tm) + (h_out, 1) -> (h_out, tm)
            h = (jnp.dot(w_ref[...], h, preferred_element_type=jnp.float32)
                 + b_ref[...])
            h = activation(h)
        w_out_ref = refs[idx]
        b_out_ref = refs[idx + 1]
        # Output layer (no activation): (1, h_last) @ (h_last, tm) + (1, 1) -> (1, tm)
        q = (jnp.dot(w_out_ref[...], h, preferred_element_type=jnp.float32)
             + b_out_ref[...])
        o_ref[...] = q.astype(o_ref.dtype)

    return kernel


def mlp_q_forward(obs, act, params, *, tm=512, activation=None):
    """obs: (B, obs_dim), act: (B, act_dim) -> q: (B,).

    params: [(W1, b1), ..., (Wn, bn), (W_out, b_out)] in PyTorch nn.Linear
    layout (W: (out, in), b: (out,)).  activation defaults to ReLU.
    """
    if activation is None:
        activation = lambda x: jnp.maximum(x, 0.0)        # nn.ReLU

    *hidden_layers, (w_out, b_out) = params
    num_hidden = len(hidden_layers)

    B, obs_dim = obs.shape
    _, act_dim = act.shape
    in_dim = obs_dim + act_dim

    # Batch tile: multiple of 128 (lane-dense stores), capped at `tm`,
    # no bigger than the (128-rounded) batch itself.
    tm_eff = min(tm, ((B + 127) // 128) * 128)
    n_tiles = pl.cdiv(B, tm_eff)
    B_pad = n_tiles * tm_eff

    # Single concatenated layer-1 input, zero-padded batch, transposed so the
    # kernel's activations/outputs are lane-dense (features on sublanes,
    # batch on lanes).  These are fusible XLA copy ops.
    x = jnp.concatenate([obs, act], axis=-1).astype(jnp.float32)
    x = jnp.pad(x, ((0, B_pad - B), (0, 0)))
    xt = x.T                                              # (in_dim, B_pad)

    # Assemble kernel inputs + BlockSpecs.
    const_spec = lambda shape: pl.BlockSpec(shape, lambda i: (0, 0))
    inputs = [xt]
    in_specs = [pl.BlockSpec((in_dim, tm_eff), lambda i: (0, i))]
    for (w, b) in hidden_layers:
        h_out, h_in = w.shape
        inputs.append(w.astype(jnp.float32))
        in_specs.append(const_spec((h_out, h_in)))
        inputs.append(b.reshape(h_out, 1).astype(jnp.float32))   # column bias
        in_specs.append(const_spec((h_out, 1)))
    h_last = w_out.shape[1]
    inputs.append(w_out.reshape(1, h_last).astype(jnp.float32))
    in_specs.append(const_spec((1, h_last)))
    inputs.append(b_out.reshape(1, 1).astype(jnp.float32))
    in_specs.append(const_spec((1, 1)))

    out = pl.pallas_call(
        make_mlp_q_kernel(num_hidden, activation),
        out_shape=jax.ShapeDtypeStruct((1, B_pad), jnp.float32),
        grid_spec=pltpu.PrefetchScalarGridSpec(
            num_scalar_prefetch=0,
            grid=(n_tiles,),
            in_specs=in_specs,
            out_specs=pl.BlockSpec((1, tm_eff), lambda i: (0, i)),
        ),
        compiler_params=pltpu.CompilerParams(
            dimension_semantics=("parallel",)),
    )(*inputs)

    # Squeeze + drop batch padding (wrapper glue only).
    return out[0, :B]


def init_params(key, obs_dim, act_dim, hidden_sizes):
    """PyTorch-layout params for MLP([obs_dim+act_dim] + hidden_sizes + [1])."""
    sizes = [obs_dim + act_dim] + list(hidden_sizes) + [1]
    params = []
    keys = jax.random.split(key, 2 * (len(sizes) - 1))
    for li in range(len(sizes) - 1):
        fan_in, fan_out = sizes[li], sizes[li + 1]
        w = jax.random.normal(keys[2 * li], (fan_out, fan_in), jnp.float32) * 0.1
        b = jax.random.normal(keys[2 * li + 1], (fan_out,), jnp.float32) * 0.1
        params.append((w, b))
    return params


def reference_forward(obs, act, params):
    """Pure-JAX reference of the PyTorch forward (Linear uses x @ W.T + b)."""
    x = jnp.concatenate([obs, act], axis=-1)
    *hidden_layers, (w_out, b_out) = params
    h = x
    for (w, b) in hidden_layers:
        h = jnp.maximum(h @ w.T + b, 0.0)
    q = h @ w_out.T + b_out
    return jnp.squeeze(q, -1)


if __name__ == "__main__":
    obs_dim, act_dim = 24, 8
    hidden_sizes = [32, 32]

    key = jax.random.PRNGKey(0)
    k_obs, k_act, k_par, k_obs2, k_act2 = jax.random.split(key, 5)
    params = init_params(k_par, obs_dim, act_dim, hidden_sizes)

    # Small batch (pads up to one 128-wide tile).
    B = 8
    obs = jax.random.normal(k_obs, (B, obs_dim), jnp.float32)
    act = jax.random.normal(k_act, (B, act_dim), jnp.float32)
    q = jax.block_until_ready(mlp_q_forward(obs, act, params))
    q_ref = reference_forward(obs, act, params)
    assert q.shape == (B,)
    assert jnp.allclose(q, q_ref, atol=1e-4, rtol=1e-4)

    # Batch not a multiple of the tile (exercises cdiv + zero padding).
    B2 = 300
    obs2 = jax.random.normal(k_obs2, (B2, obs_dim), jnp.float32)
    act2 = jax.random.normal(k_act2, (B2, act_dim), jnp.float32)
    q2 = jax.block_until_ready(mlp_q_forward(obs2, act2, params))
    q2_ref = reference_forward(obs2, act2, params)
    assert q2.shape == (B2,)
    assert jnp.allclose(q2, q2_ref, atol=1e-4, rtol=1e-4)

    print("KERNEL_OK")
</pallas_src>

<mosaic_0001>
module attributes {stable_mosaic.version = 11 : i64} {
  func.func @kernel(%arg0: i32, %arg1: memref<32x128xf32, #tpu.memory_space<vmem>>, %arg2: memref<32x32xf32, #tpu.memory_space<vmem>>, %arg3: memref<32x1xf32, #tpu.memory_space<vmem>>, %arg4: memref<32x32xf32, #tpu.memory_space<vmem>>, %arg5: memref<32x1xf32, #tpu.memory_space<vmem>>, %arg6: memref<1x32xf32, #tpu.memory_space<vmem>>, %arg7: memref<1x1xf32, #tpu.memory_space<vmem>>, %arg8: memref<1x128xf32, #tpu.memory_space<vmem>>) attributes {dimension_semantics = [#tpu.dimension_semantics<parallel>], iteration_bounds = array<i64: 1>, scalar_prefetch = 0 : i64, scratch_operands = 0 : i64, tpu.core_type = #tpu.core_type<tc>, window_params = [{transform_indices = @transform_0, window_bounds = array<i64: 32, 128>}, {pipeline_mode = #tpu.pipeline_mode<synchronous>, transform_indices = @transform_1, window_bounds = array<i64: 32, 32>}, {pipeline_mode = #tpu.pipeline_mode<synchronous>, transform_indices = @transform_2, window_bounds = array<i64: 32, 1>}, {pipeline_mode = #tpu.pipeline_mode<synchronous>, transform_indices = @transform_3, window_bounds = array<i64: 32, 32>}, {pipeline_mode = #tpu.pipeline_mode<synchronous>, transform_indices = @transform_4, window_bounds = array<i64: 32, 1>}, {pipeline_mode = #tpu.pipeline_mode<synchronous>, transform_indices = @transform_5, window_bounds = array<i64: 1, 32>}, {pipeline_mode = #tpu.pipeline_mode<synchronous>, transform_indices = @transform_6, window_bounds = array<i64: 1, 1>}, {transform_indices = @transform_7, window_bounds = array<i64: 1, 128>}]} {
    %c0 = arith.constant 0 : index
    %c0_0 = arith.constant 0 : index
    %0 = vector.load %arg1[%c0, %c0_0] : memref<32x128xf32, #tpu.memory_space<vmem>>, vector<32x128xf32>
    %c0_1 = arith.constant 0 : index
    %c0_2 = arith.constant 0 : index
    %1 = vector.load %arg2[%c0_1, %c0_2] : memref<32x32xf32, #tpu.memory_space<vmem>>, vector<32x32xf32>
    %cst = arith.constant dense<0.000000e+00> : vector<32x128xf32>
    %2 = tpu.matmul %1, %0, %cst {dimension_numbers = #tpu.dot_dimension_numbers<[1], [0], [0], [1], [0, 0, 1, 1], [], []>} : vector<32x32xf32>, vector<32x128xf32>, vector<32x128xf32> -> vector<32x128xf32>
    %c0_3 = arith.constant 0 : index
    %c0_4 = arith.constant 0 : index
    %3 = vector.load %arg3[%c0_3, %c0_4] : memref<32x1xf32, #tpu.memory_space<vmem>>, vector<32x1xf32>
    %4 = vector.broadcast %3 : vector<32x1xf32> to vector<32x128xf32>
    %5 = arith.addf %2, %4 : vector<32x128xf32>
    %cst_5 = arith.constant 0.000000e+00 : f32
    %6 = vector.broadcast %cst_5 : f32 to vector<32x128xf32>
    %7 = arith.maximumf %5, %6 : vector<32x128xf32>
    %c0_6 = arith.constant 0 : index
    %c0_7 = arith.constant 0 : index
    %8 = vector.load %arg4[%c0_6, %c0_7] : memref<32x32xf32, #tpu.memory_space<vmem>>, vector<32x32xf32>
    %cst_8 = arith.constant dense<0.000000e+00> : vector<32x128xf32>
    %9 = tpu.matmul %8, %7, %cst_8 {dimension_numbers = #tpu.dot_dimension_numbers<[1], [0], [0], [1], [0, 0, 1, 1], [], []>} : vector<32x32xf32>, vector<32x128xf32>, vector<32x128xf32> -> vector<32x128xf32>
    %c0_9 = arith.constant 0 : index
    %c0_10 = arith.constant 0 : index
    %10 = vector.load %arg5[%c0_9, %c0_10] : memref<32x1xf32, #tpu.memory_space<vmem>>, vector<32x1xf32>
    %11 = vector.broadcast %10 : vector<32x1xf32> to vector<32x128xf32>
    %12 = arith.addf %9, %11 : vector<32x128xf32>
    %cst_11 = arith.constant 0.000000e+00 : f32
    %13 = vector.broadcast %cst_11 : f32 to vector<32x128xf32>
    %14 = arith.maximumf %12, %13 : vector<32x128xf32>
    %c0_12 = arith.constant 0 : index
    %c0_13 = arith.constant 0 : index
    %15 = vector.load %arg6[%c0_12, %c0_13] : memref<1x32xf32, #tpu.memory_space<vmem>>, vector<1x32xf32>
    %cst_14 = arith.constant dense<0.000000e+00> : vector<1x128xf32>
    %16 = tpu.matmul %15, %14, %cst_14 {dimension_numbers = #tpu.dot_dimension_numbers<[1], [0], [0], [1], [0, 0, 1, 1], [], []>} : vector<1x32xf32>, vector<32x128xf32>, vector<1x128xf32> -> vector<1x128xf32>
    %c0_15 = arith.constant 0 : index
    %c0_16 = arith.constant 0 : index
    %17 = vector.load %arg7[%c0_15, %c0_16] : memref<1x1xf32, #tpu.memory_space<vmem>>, vector<1x1xf32>
    %18 = vector.broadcast %17 : vector<1x1xf32> to vector<1x128xf32>
    %19 = arith.addf %16, %18 : vector<1x128xf32>
    %c0_17 = arith.constant 0 : index
    %c0_18 = arith.constant 0 : index
    %20 = vector.load %arg8[%c0_17, %c0_18] : memref<1x128xf32, #tpu.memory_space<vmem>>, vector<1x128xf32>
    tpu.vector_store %arg8[%c0_17, %c0_18], %19 {strides = array<i32>} : memref<1x128xf32, #tpu.memory_space<vmem>>, vector<1x128xf32>,
    return
  }
  func.func @transform_0(%arg0: i32) -> (i32, i32) {
    %c0_i32 = arith.constant 0 : i32
    %c0_i32_0 = arith.constant 0 : i32
    return %c0_i32, %arg0 : i32, i32
  }
  func.func @transform_1(%arg0: i32) -> (i32, i32) {
    %c0_i32 = arith.constant 0 : i32
    %c0_i32_0 = arith.constant 0 : i32
    %c0_i32_1 = arith.constant 0 : i32
    return %c0_i32, %c0_i32_0 : i32, i32
  }
  func.func @transform_2(%arg0: i32) -> (i32, i32) {
    %c0_i32 = arith.constant 0 : i32
    %c0_i32_0 = arith.constant 0 : i32
    %c0_i32_1 = arith.constant 0 : i32
    return %c0_i32, %c0_i32_0 : i32, i32
  }
  func.func @transform_3(%arg0: i32) -> (i32, i32) {
    %c0_i32 = arith.constant 0 : i32
    %c0_i32_0 = arith.constant 0 : i32
    %c0_i32_1 = arith.constant 0 : i32
    return %c0_i32, %c0_i32_0 : i32, i32
  }
  func.func @transform_4(%arg0: i32) -> (i32, i32) {
    %c0_i32 = arith.constant 0 : i32
    %c0_i32_0 = arith.constant 0 : i32
    %c0_i32_1 = arith.constant 0 : i32
    return %c0_i32, %c0_i32_0 : i32, i32
  }
  func.func @transform_5(%arg0: i32) -> (i32, i32) {
    %c0_i32 = arith.constant 0 : i32
    %c0_i32_0 = arith.constant 0 : i32
    %c0_i32_1 = arith.constant 0 : i32
    return %c0_i32, %c0_i32_0 : i32, i32
  }
  func.func @transform_6(%arg0: i32) -> (i32, i32) {
    %c0_i32 = arith.constant 0 : i32
    %c0_i32_0 = arith.constant 0 : i32
    %c0_i32_1 = arith.constant 0 : i32
    return %c0_i32, %c0_i32_0 : i32, i32
  }
  func.func @transform_7(%arg0: i32) -> (i32, i32) {
    %c0_i32 = arith.constant 0 : i32
    %c0_i32_0 = arith.constant 0 : i32
    return %c0_i32, %arg0 : i32, i32
  }
}

</mosaic_0001>

<bundles_post_ra>
// kernel: tpu_custom_call.1
= control target key start
LH: loop header
LB: loop body
LE: loop exit
PB: predicated region body
PF: predicated region fallthrough
CT: control target
= control target key end

     0   :  { %s690_s0 = inlined_call_operand.vmem [shape: f32[32,128], index: 0, kind: input, shape index: {}]   ;;  %s691_s1 = inlined_call_operand.vmem [shape: f32[32,32], index: 1, kind: input, shape index: {}]   ;;  %s692_s2 = inlined_call_operand.vmem [shape: f32[32,1], index: 2, kind: input, shape index: {}]   ;;  %s693_s3 = inlined_call_operand.hbm [shape: f32[32,32], index: 3, kind: input, shape index: {}]   ;;  %s694_s4 = inlined_call_operand.vmem [shape: f32[32,1], index: 4, kind: input, shape index: {}]   ;;  %s695_s5 = inlined_call_operand.vmem [shape: f32[1,32], index: 5, kind: input, shape index: {}]   ;;  %s696_s6 = inlined_call_operand.<no memory space> [shape: f32[1,1], index: 6, kind: input, shape index: {}]   ;;  %s697_s7 = inlined_call_operand.hbm [shape: f32[1,128], index: 7, kind: output, shape index: {}]  }
   0x1   :  { %v12_v0 = vstv %s696_s6 }
   0x2   :  { %13 = vst [vmem:[#allocation2] sm:$0x1] %v12_v0 }
   0x3   :  { %14 = vsyncpa [#allocation4], 0 }
   0x4   :  { %15 = vsyncpa [#allocation5], 0  ;;  %s555_s26 = smov [#allocation3]   ;;  %s507_s30 = scalar_lea.hbm %s693_s3, 512 }
   0x5   :  { %s27_s27 = sshll.u32 %s555_s26, 4  ;;  %p508_p0 = scmp.ne.s32.totalorder %s693_s3, %s507_s30  ;;  %s28_s27 = int_to_ptr.vmem [resolvable:$true] %s27_s27 }
   0x6   :  { %p511_p1 = scmp.lt.u32.totalorder %s507_s30, %s693_s3 }
   0x8   :  { %p513_p2 = pnand %p511_p1, %p508_p0 }
   0xa   :  { %516 = shalt.err (!%p513_p2)
}
   0xb   :  { %s517_s6 = scalar_lea.vmem %s28_s27, 512  ;;  %p522_p4 = scmp.lt.s32.totalorder %s28_s27, %s28_s27 }
   0xc   :  { %p518_p3 = scmp.ne.s32.totalorder %s28_s27, %s517_s6  ;;  %p523_p5 = scmp.lt.s32.totalorder %s517_s6, %s517_s6 }
   0xe   :  { %p524_p6 = por %p523_p5, %p522_p4 }
  0x10   :  { %p525_p7 = pnand %p524_p6, %p518_p3 }
  0x12   :  { %528 = shalt.err (!%p525_p7)
}
  0x13   :  { %s556_s12 = smov 128   ;;  %s557_s13 = smov 8  }
  0x14   :  { %33 = dma.hbm_to_vmem [thread:$0]  %s693_s3, 512, %s28_s27, [#allocation4], %s556_s12, %s556_s12, %s557_s13  }
  0x15   :  { %551 = dma.done.wait [#allocation4], 512  }
  0x16   :  { %552 = vsyncadd [#allocation4], 4294966784  ;;  %v558_v1 = vmov 0   ;;  %vm75_vm0 = vcmask 261120   ;;  %v43_v2 = vld [vmem:[%s690_s0] sm:$0xff]  ;;  %v44_v3 = vld [vmem:[%s690_s0 + $0x8] sm:$0xff]  ;;  %v313_v0 = vlaneseq }
  0x17   :  { %505 = vset.pattern.permute.xlu0 %v558_v1  ;;  %506 = vset.pattern.permute.xlu1 %v558_v1  ;;  %v45_v4 = vld [vmem:[%s690_s0 + $0x10] sm:$0xff]  ;;  %v475_v5 = vpack.c.bf16 %v44_v3, %v43_v2  ;;  %v46_v6 = vld [vmem:[%s690_s0 + $0x18] sm:$0xff]  ;;  %v47_v7 = vld [vmem:[%s691_s1] sm:$0xff]  ;;  %v559_v43 = vmov 0.0|0.0   ;;  %vm560_vm1 = vmmov 0   ;;  %v561_v44 = vmov 0.0  }
  0x18   :  { %v479_v8 = vpack.c.bf16 %v46_v6, %v45_v4  ;;  %444 = vmatprep.mubr.msk.f32.mxu0 %vm75_vm0, %v47_v7  ;;  %v51_v9 = vld [vmem:[%s692_s2] sm:$0xff]  ;;  %v53_v10 = vld [vmem:[%s692_s2 + $0x10] sm:$0xff]  ;;  %v52_v11 = vld [vmem:[%s692_s2 + $0x8] sm:$0xff]  ;;  %v314_v1 = vshrl.u32 %v313_v0, 7  ;;  %s562_s21 = smov [#allocation6]  }
  0x19   :  { %476 = vmatprep.subr.bf16.mxu0 %v475_v5  ;;  %57 = vperm.xlu0 %505, %v51_v9   ;;  %v54_v12 = vld [vmem:[%s692_s2 + $0x18] sm:$0xff]  ;;  %v48_v13 = vld [vmem:[%s691_s1 + $0x8] sm:$0xff]  ;;  %v181_v14 = vld [vmem:[%s694_s4] sm:$0xff]  ;;  %s397_s3 = sshll.u32 %s562_s21, 4  ;;  %s398_s3 = int_to_ptr.vmem [resolvable:$true] %s397_s3 }
  0x1a   :  { %478 = vmatpush3.bf16.msra.mxu0 %v475_v5  ;;  %67 = vperm.xlu1 %506, %v53_v10   ;;  %v49_v15 = vld [vmem:[%s691_s1 + $0x10] sm:$0xff]  ;;  %v182_v16 = vld [vmem:[%s694_s4 + $0x8] sm:$0xff]  ;;  %v50_v17 = vld [vmem:[%s691_s1 + $0x18] sm:$0xff]  ;;  %v315_v2 = vsub.s32 0, %v314_v1  ;;  %s529_s22 = scalar_lea.vmem %s398_s3, 16  ;;  %s533_s23 = scalar_lea.vmem %s398_s3, 32 }
  0x1b   :  { %480 = vmatprep.subr.bf16.mxu0 %v479_v8  ;;  %v183_v18 = vld [vmem:[%s694_s4 + $0x10] sm:$0xff]  ;;  %v184_v19 = vld [vmem:[%s694_s4 + $0x18] sm:$0xff]  ;;  %v307_v20 = vld [vmem:[#allocation2] sm:$0x1]  ;;  %p530_p8 = scmp.ne.s32.totalorder %s398_s3, %s529_s22  ;;  %p534_p9 = scmp.lt.s32.totalorder %s398_s3, %s398_s3 }
  0x1c   :  { %v177_v21 = vld [vmem:[#allocation3] sm:$0xff]  ;;  %v178_v40 = vld [vmem:[#allocation3 + $0x8] sm:$0xff]  ;;  %v179_v41 = vld [vmem:[#allocation3 + $0x10] sm:$0xff]  ;;  %p535_p10 = scmp.lt.s32.totalorder %s533_s23, %s529_s22 }
  0x1d   :  { %62 = vperm.xlu0 %505, %v52_v11   ;;  %458 = vmatprep.mubr.msk.f32.mxu1 %vm75_vm0, %v177_v21  ;;  %v180_v42 = vld [vmem:[#allocation3 + $0x18] sm:$0xff] }
  0x1e   :  { %482 = vmatpush3.bf16.msra.mxu0 %v479_v8  ;;  %72 = vperm.xlu1 %506, %v54_v12   ;;  %v306_v63 = vld [vmem:[%s695_s5] sm:$0x1]  ;;  %p536_p11 = por %p535_p10, %p534_p9 }
  0x1f   :  { %491 = vmatprep.subr.bf16.mxu0 %v559_v43 }
  0x20   :  { %p537_p12 = pnand %p536_p11, %p530_p8 }
  0x21   :  { %445 = vmatmul.mubr.msk.f32.vlgmr.msra.gmra.mrb[0].mxu0 %vm75_vm0, %v48_v13  ;;  %187 = vperm.xlu0 %505, %v181_v14  }
  0x22   :  { %447 = vmatprep.mubr.msk.f32.mxu0 %vm75_vm0, %v49_v15  ;;  %192 = vperm.xlu1 %506, %v182_v16  }
  0x25   :  { %448 = vmatmul.mubr.msk.f32.gmra.mrb[2].mxu0 %vm75_vm0, %v50_v17  ;;  %197 = vperm.xlu0 %505, %v183_v18  }
  0x26   :  { %202 = vperm.xlu1 %506, %v184_v19   ;;  %472 = vmatprep.mubr.msk.f32.mxu0 %vm560_vm1, %v561_v44 }
  0x29   :  { %310 = vperm.xlu0 %505, %v307_v20  }
  0x98   :  { %v58_v22 = vpop.permute.xlu0 %57 }
  0x99   :  { %v68_v23 = vpop.permute.xlu1 %67 }
  0x9c   :  { %v63_v24 = vpop.permute.xlu0 %62 }
  0x9d   :  { %v73_v30 = vpop.permute.xlu1 %72 }
  0xa0   :  { %v188_v46 = vpop.permute.xlu0 %187 }
  0xa1   :  { %v193_v45 = vpop.permute.xlu1 %192 }
  0xa4   :  { %v198_v55 = vpop.permute.xlu0 %197 }
  0xa5   :  { %v203_v52 = vpop.permute.xlu1 %202 }
  0xa8   :  { %v311_v3 = vpop.permute.xlu0 %310 }
  0xa9   :  { %v316_v4 = vrot.slane %v311_v3, %v315_v2 }
  0xf4   :  { %v446_v25 = vpop.f32.mrb[0].mxu0 }
  0xf5   :  { %v160_v26 = vadd.f32 %v446_v25, %v63_v24  ;;  %v154_v27 = vpop.f32.mrb[1].mxu0 }
  0xf6   :  { %v155_v28 = vadd.f32 %v154_v27, %v58_v22 }
  0xf7   :  { %v174_v29 = vmax.f32 %v160_v26, 0.0 }
  0xf8   :  { %v173_v31 = vmax.f32 %v155_v28, 0.0  ;;  %v449_v32 = vpop.f32.mrb[2].mxu0 }
  0xf9   :  { %v170_v33 = vadd.f32 %v449_v32, %v73_v30  ;;  %v164_v34 = vpop.f32.mrb[3].mxu0 }
  0xfa   :  { %v165_v35 = vadd.f32 %v164_v34, %v68_v23  ;;  %v483_v36 = vpack.c.bf16 %v174_v29, %v173_v31 }
  0xfb   :  { %v176_v37 = vmax.f32 %v170_v33, 0.0 }
  0xfc   :  { %v175_v38 = vmax.f32 %v165_v35, 0.0  ;;  %484 = vmatprep.subr.bf16.mxu1 %v483_v36 }
  0xfd   :  { %486 = vmatpush3.bf16.msra.mxu1 %v483_v36 }
  0xfe   :  { %v487_v39 = vpack.c.bf16 %v176_v37, %v175_v38 }
 0x100   :  { %488 = vmatprep.subr.bf16.mxu1 %v487_v39 }
 0x101   :  { %490 = vmatpush3.bf16.msra.mxu1 %v487_v39 }
 0x104   :  { %459 = vmatmul.mubr.msk.f32.vlgmr.msra.gmra.mrb[0].mxu1 %vm75_vm0, %v178_v40 }
 0x105   :  { %461 = vmatprep.mubr.msk.f32.mxu1 %vm75_vm0, %v179_v41 }
 0x108   :  { %462 = vmatmul.mubr.msk.f32.gmra.mrb[2].mxu1 %vm75_vm0, %v180_v42 }
 0x1d7   :  { %v460_v47 = vpop.f32.mrb[0].mxu1 }
 0x1d8   :  { %v289_v48 = vadd.f32 %v460_v47, %v193_v45  ;;  %v283_v49 = vpop.f32.mrb[1].mxu1 }
 0x1d9   :  { %v284_v50 = vadd.f32 %v283_v49, %v188_v46 }
 0x1da   :  { %v303_v51 = vmax.f32 %v289_v48, 0.0 }
 0x1db   :  { %v302_v53 = vmax.f32 %v284_v50, 0.0  ;;  %v463_v54 = vpop.f32.mrb[2].mxu1 }
 0x1dc   :  { %v299_v56 = vadd.f32 %v463_v54, %v203_v52  ;;  %v293_v57 = vpop.f32.mrb[3].mxu1 }
 0x1dd   :  { %v492_v58 = vpack.c.bf16 %v303_v51, %v302_v53  ;;  %v294_v59 = vadd.f32 %v293_v57, %v198_v55 }
 0x1de   :  { %v305_v60 = vmax.f32 %v299_v56, 0.0 }
 0x1df   :  { %v304_v61 = vmax.f32 %v294_v59, 0.0  ;;  %493 = vmatpush3.bf16.msra.mxu0 %v492_v58 }
 0x1e0   :  { %494 = vmatprep.subr.bf16.mxu0 %v559_v43 }
 0x1e1   :  { %v495_v62 = vpack.c.bf16 %v305_v60, %v304_v61 }
 0x1e3   :  { %496 = vmatpush3.bf16.msra.mxu0 %v495_v62 }
 0x1e6   :  { %473 = vmatmul.mubr.msk.f32.vlgmr.msra.gmra.mrb[4].mxu0 %vm75_vm0, %v306_v63 }
 0x2b9   :  { %v386_v5 = vpop.f32.mrb[4].mxu0 }
 0x2ba   :  { %v387_v6 = vadd.f32 %v386_v5, %v316_v4  ;;  %v474_v7 = vpop.f32.mrb[5].mxu0 }
 0x2bc   :  { %390 = vst [vmem:[#allocation6] sm:$0x1] %v387_v6 }
 0x2bd   :  { %540 = shalt.err (!%p537_p12)
}
 0x2be   :  { %s541_s25 = scalar_lea.hbm %s697_s7, 16 }
 0x2bf   :  { %p542_p13 = scmp.ne.s32.totalorder %s697_s7, %s541_s25  ;;  %p545_p0 = scmp.lt.u32.totalorder %s541_s25, %s697_s7 }
 0x2c1   :  { %p547_p1 = pnand %p545_p0, %p542_p13 }
 0x2c3   :  { %550 = shalt.err (!%p547_p1)
}
 0x2c4   :  { %400 = dma.vmem_to_hbm [thread:$0]  %s398_s3, 16, %s697_s7, [#allocation5]  }
 0x2c5   :  { %553 = dma.done.wait [#allocation5], 16  }
 0x2c6   :  { %554 = vsyncadd [#allocation5], 4294967280 }
 0x2c7   :  { %404 = vsyncpa [#allocation4], 1 }
 0x2c8   :  { %405 = vsyncpa [#allocation5], 1 }

</bundles_post_ra>
